<compile_context>
chip_gen: v6e
topology: v6e:2x2x1
jax: 0.10.0
libtpu: 0.0.40
codegen_flags: <defaults>
</compile_context>

<pallas_src>
import functools
import math

import jax
import jax.numpy as jnp
from jax.experimental import pallas as pl
from jax.experimental.pallas import tpu as pltpu

_NEG_INF = -1e30  # finite "minus inf": avoids inf-inf NaNs in the online softmax


# ---------------------------------------------------------------------------
# Kernel 1: fused QKV projection + flash attention (per-head output).
# ---------------------------------------------------------------------------
def _qkv_flash_attention_kernel(
    xq_ref, xkv_ref, wq_ref, wk_ref, wv_ref, bq_ref, bk_ref, bv_ref,   # inputs
    o_ref,                                                             # output
    q_scr, m_scr, l_scr, acc_scr, k_cache, v_cache,                    # scratch
    *, scale: float, causal_mask: bool, tq: int, tk: int):
    qi = pl.program_id(2)
    ki = pl.program_id(3)
    n_kv = pl.num_programs(3)

    cdt = xq_ref.dtype  # native MXU compute dtype (bf16 inputs stay bf16)

    # ---- Project K/V for this head exactly once (first q tile) into VMEM. --
    @pl.when(qi == 0)
    def _():
        xkv = xkv_ref[0]                                               # (tk, D)
        k = jnp.dot(xkv, wk_ref[0], preferred_element_type=jnp.float32) + bk_ref[0]
        v = jnp.dot(xkv, wv_ref[0], preferred_element_type=jnp.float32) + bv_ref[0]
        k_cache[ki] = k.astype(cdt)
        v_cache[ki] = v.astype(cdt)

    # ---- New q tile: project q once (reused over kv tiles), reset state. ---
    @pl.when(ki == 0)
    def _():
        q = jnp.dot(xq_ref[0], wq_ref[0], preferred_element_type=jnp.float32)
        # Module applies d_head**-0.5 twice -> folded single 1/d_head scale.
        q_scr[...] = ((q + bq_ref[0]) * scale).astype(cdt)
        m_scr[...] = jnp.full(m_scr.shape, _NEG_INF, m_scr.dtype)
        l_scr[...] = jnp.zeros(l_scr.shape, l_scr.dtype)
        acc_scr[...] = jnp.zeros(acc_scr.shape, acc_scr.dtype)

    def _process_kv_tile():
        k = k_cache[ki]                                                # (tk, dh)
        v = v_cache[ki]
        # s = q @ k^T without materializing a transpose.
        s = jax.lax.dot_general(q_scr[...], k, (((1,), (1,)), ((), ())),
                                preferred_element_type=jnp.float32)    # (tq, tk)
        if causal_mask:
            row = qi * tq + jax.lax.broadcasted_iota(jnp.int32, (tq, tk), 0)
            col = ki * tk + jax.lax.broadcasted_iota(jnp.int32, (tq, tk), 1)
            s = jnp.where(col > row, _NEG_INF, s)

        m_prev = m_scr[...]
        m_new = jnp.maximum(m_prev, jnp.max(s, axis=-1, keepdims=True))
        alpha = jnp.exp(m_prev - m_new)
        p = jnp.exp(s - m_new)
        l_scr[...] = alpha * l_scr[...] + jnp.sum(p, axis=-1, keepdims=True)
        acc_scr[...] = alpha * acc_scr[...] + jnp.dot(
            p.astype(cdt), v, preferred_element_type=jnp.float32)
        m_scr[...] = m_new

    if causal_mask:
        # Fully-masked kv tiles: skip the compute.  The K/V cache fill above
        # still runs at qi == 0 because later q tiles need the full sequence.
        pl.when(ki * tk <= qi * tq + (tq - 1))(_process_kv_tile)
    else:
        _process_kv_tile()

    # ---- Finalize this (head, q tile): normalize and emit (tq, d_head). ----
    @pl.when(ki == n_kv - 1)
    def _():
        inv_l = pl.reciprocal(l_scr[...], approx=True)
        o_ref[0, 0] = (acc_scr[...] * inv_l).astype(o_ref.dtype)


# ---------------------------------------------------------------------------
# Kernel 2: head concat + out_proj (accumulated over heads in f32 VMEM).
# ---------------------------------------------------------------------------
def _concat_out_proj_kernel(attn_ref, wo_ref, bo_ref, o_ref, acc_scr):
    h = pl.program_id(2)
    n_heads = pl.num_programs(2)

    @pl.when(h == 0)
    def _():
        acc_scr[...] = jnp.zeros(acc_scr.shape, acc_scr.dtype)

    acc_scr[...] += jnp.dot(attn_ref[0, 0], wo_ref[0],
                            preferred_element_type=jnp.float32)

    @pl.when(h == n_heads - 1)
    def _():
        o_ref[0] = (acc_scr[...] + bo_ref[...]).astype(o_ref.dtype)


# ---------------------------------------------------------------------------
# Wrapper
# ---------------------------------------------------------------------------
def self_attention(x, w_in, b_in, w_out, b_out, *, n_heads: int,
                   causal_mask: bool = False,
                   q_tile: int = 256, kv_tile: int = 128, out_row_tile: int = 512):
    """x: (B, S, D); w_in: (3D, D) torch-Linear layout; w_out: (D, D)."""
    B, S, D = x.shape
    assert D % n_heads == 0, "d_embed must be divisible by n_heads"
    d_head = D // n_heads

    tq = min(q_tile, S)
    tk = min(kv_tile, S)
    to = min(out_row_tile, S)
    assert S % tq == 0 and S % tk == 0 and S % to == 0, \
        "seq_len must be divisible by the tile sizes"
    n_q, n_kv, n_o = S // tq, S // tk, S // to

    # --- one-time wrapper-side weight re-layout into per-head blocks --------
    w_in_t = w_in.T                                        # (D, 3D): x @ w_in_t
    wq = w_in_t[:, 0 * D:1 * D].reshape(D, n_heads, d_head).transpose(1, 0, 2)
    wk = w_in_t[:, 1 * D:2 * D].reshape(D, n_heads, d_head).transpose(1, 0, 2)
    wv = w_in_t[:, 2 * D:3 * D].reshape(D, n_heads, d_head).transpose(1, 0, 2)
    bq = b_in[0 * D:1 * D].reshape(n_heads, 1, d_head)
    bk = b_in[1 * D:2 * D].reshape(n_heads, 1, d_head)
    bv = b_in[2 * D:3 * D].reshape(n_heads, 1, d_head)
    wo = w_out.T.reshape(n_heads, d_head, D)               # per-head out-proj rows
    bo = b_out.reshape(1, D)

    attn_kernel = functools.partial(
        _qkv_flash_attention_kernel,
        scale=1.0 / d_head,          # d_head**-0.5 applied twice -> 1/d_head
        causal_mask=causal_mask, tq=tq, tk=tk)

    def head_spec(shape):
        return pl.BlockSpec(shape, lambda b, h, qi, ki: (h, 0, 0))

    def xkv_index(b, h, qi, ki):
        # x kv-rows are only consumed at qi == 0 (K/V cache fill); pin the
        # block index for qi > 0 so those steps reuse the resident block and
        # issue no new DMA.
        return (b, jnp.where(qi == 0, ki, n_kv - 1), 0)

    # ---- Stage 1: per-head flash attention with in-kernel QKV projection. --
    attn = pl.pallas_call(
        attn_kernel,
        out_shape=jax.ShapeDtypeStruct((B, n_heads, S, d_head), x.dtype),
        grid_spec=pltpu.PrefetchScalarGridSpec(
            num_scalar_prefetch=0,
            grid=(B, n_heads, n_q, n_kv),
            in_specs=[
                pl.BlockSpec((1, tq, D), lambda b, h, qi, ki: (b, qi, 0)),  # x (q rows)
                pl.BlockSpec((1, tk, D), xkv_index),                        # x (kv rows)
                head_spec((1, D, d_head)),   # wq
                head_spec((1, D, d_head)),   # wk
                head_spec((1, D, d_head)),   # wv
                head_spec((1, 1, d_head)),   # bq
                head_spec((1, 1, d_head)),   # bk
                head_spec((1, 1, d_head)),   # bv
            ],
            out_specs=pl.BlockSpec((1, 1, tq, d_head),
                                   lambda b, h, qi, ki: (b, h, qi, 0)),
            scratch_shapes=[
                pltpu.VMEM((tq, d_head), x.dtype),          # scaled q tile (compute dtype)
                pltpu.VMEM((tq, 1), jnp.float32),           # running max
                pltpu.VMEM((tq, 1), jnp.float32),           # running denominator
                pltpu.VMEM((tq, d_head), jnp.float32),      # attention numerator
                pltpu.VMEM((n_kv, tk, d_head), x.dtype),    # per-head K cache (full seq)
                pltpu.VMEM((n_kv, tk, d_head), x.dtype),    # per-head V cache (full seq)
            ]),
        compiler_params=pltpu.CompilerParams(
            dimension_semantics=("parallel", "parallel", "arbitrary", "arbitrary")),
    )(x, x, wq, wk, wv, bq, bk, bv)

    # ---- Stage 2: concat heads + out_proj with lane-dense (to, D) stores. --
    out = pl.pallas_call(
        _concat_out_proj_kernel,
        out_shape=jax.ShapeDtypeStruct((B, S, D), x.dtype),
        grid_spec=pltpu.PrefetchScalarGridSpec(
            num_scalar_prefetch=0,
            grid=(B, n_o, n_heads),
            in_specs=[
                pl.BlockSpec((1, 1, to, d_head), lambda b, r, h: (b, h, r, 0)),
                pl.BlockSpec((1, d_head, D), lambda b, r, h: (h, 0, 0)),
                pl.BlockSpec((1, D), lambda b, r, h: (0, 0)),
            ],
            out_specs=pl.BlockSpec((1, to, D), lambda b, r, h: (b, r, 0)),
            scratch_shapes=[pltpu.VMEM((to, D), jnp.float32)]),
        compiler_params=pltpu.CompilerParams(
            dimension_semantics=("parallel", "parallel", "arbitrary")),
    )(attn, wo, bo)

    return out


# ---------------------------------------------------------------------------
# Pure-JAX reference mirroring the PyTorch forward.
# ---------------------------------------------------------------------------
def _reference(x, w_in, b_in, w_out, b_out, n_heads, causal_mask=False):
    B, S, D = x.shape
    dh = D // n_heads
    qkv = x @ w_in.T + b_in
    q, k, v = jnp.split(qkv, 3, axis=-1)
    q = q.reshape(B, S, n_heads, dh).transpose(0, 2, 1, 3)
    k = k.reshape(B, S, n_heads, dh).transpose(0, 2, 1, 3)
    v = v.reshape(B, S, n_heads, dh).transpose(0, 2, 1, 3)
    w = jnp.einsum('bhqd,bhkd->bhqk', q, k) * (dh ** -0.5)
    if causal_mask:
        row = jnp.arange(S)[:, None]
        col = jnp.arange(S)[None, :]
        w = jnp.where(col > row, -jnp.inf, w)
    w = w / math.sqrt(dh)
    w = jax.nn.softmax(w, axis=-1)
    o = jnp.einsum('bhqk,bhkd->bhqd', w, v)
    o = o.transpose(0, 2, 1, 3).reshape(B, S, D)
    return o @ w_out.T + b_out


if __name__ == "__main__":
    # Small but multi-tile: d_head=16, 2 q-tiles x 2 kv-tiles of 32, 4 heads,
    # so the K/V cache-fill / reuse path and the online-softmax path are both
    # exercised across several grid steps.
    B, S, D, H = 2, 64, 64, 4

    key = jax.random.PRNGKey(0)
    kx, k1, k2, k3, k4 = jax.random.split(key, 5)

    x = jax.random.normal(kx, (B, S, D), dtype=jnp.float32)

    # nn.Linear-style init: U(-1/sqrt(fan_in), 1/sqrt(fan_in))
    bound = 1.0 / math.sqrt(D)
    w_in = jax.random.uniform(k1, (3 * D, D), jnp.float32, -bound, bound)
    b_in = jax.random.uniform(k2, (3 * D,), jnp.float32, -bound, bound)
    w_out = jax.random.uniform(k3, (D, D), jnp.float32, -bound, bound)
    b_out = jax.random.uniform(k4, (D,), jnp.float32, -bound, bound)

    out = self_attention(x, w_in, b_in, w_out, b_out, n_heads=H,
                         causal_mask=False, q_tile=32, kv_tile=32,
                         out_row_tile=32)
    out = jax.block_until_ready(out)
    ref = _reference(x, w_in, b_in, w_out, b_out, H, causal_mask=False)
    assert out.shape == (B, S, D)
    assert jnp.allclose(out, ref, atol=2e-3, rtol=2e-3), "mismatch (non-causal)"

    out_c = self_attention(x, w_in, b_in, w_out, b_out, n_heads=H,
                           causal_mask=True, q_tile=32, kv_tile=32,
                           out_row_tile=32)
    out_c = jax.block_until_ready(out_c)
    ref_c = _reference(x, w_in, b_in, w_out, b_out, H, causal_mask=True)
    assert jnp.allclose(out_c, ref_c, atol=2e-3, rtol=2e-3), "mismatch (causal)"

    print("KERNEL_OK")
</pallas_src>

<mosaic_0001>
module attributes {stable_mosaic.version = 11 : i64} {
  func.func @_qkv_flash_attention_kernel(%arg0: i32, %arg1: i32, %arg2: i32, %arg3: i32, %arg4: memref<1x32x64xf32, #tpu.memory_space<vmem>>, %arg5: memref<1x32x64xf32, #tpu.memory_space<vmem>>, %arg6: memref<1x64x16xf32, #tpu.memory_space<vmem>>, %arg7: memref<1x64x16xf32, #tpu.memory_space<vmem>>, %arg8: memref<1x64x16xf32, #tpu.memory_space<vmem>>, %arg9: memref<1x1x16xf32, #tpu.memory_space<vmem>>, %arg10: memref<1x1x16xf32, #tpu.memory_space<vmem>>, %arg11: memref<1x1x16xf32, #tpu.memory_space<vmem>>, %arg12: memref<1x1x32x16xf32, #tpu.memory_space<vmem>>, %arg13: memref<32x16xf32, #tpu.memory_space<vmem>>, %arg14: memref<32x1xf32, #tpu.memory_space<vmem>>, %arg15: memref<32x1xf32, #tpu.memory_space<vmem>>, %arg16: memref<32x16xf32, #tpu.memory_space<vmem>>, %arg17: memref<2x32x16xf32, #tpu.memory_space<vmem>>, %arg18: memref<2x32x16xf32, #tpu.memory_space<vmem>>) attributes {dimension_semantics = [#tpu.dimension_semantics<parallel>, #tpu.dimension_semantics<parallel>, #tpu.dimension_semantics<arbitrary>, #tpu.dimension_semantics<arbitrary>], iteration_bounds = array<i64: 2, 4, 2, 2>, scalar_prefetch = 0 : i64, scratch_operands = 6 : i64, tpu.core_type = #tpu.core_type<tc>, window_params = [{transform_indices = @transform_0, window_bounds = array<i64: 1, 32, 64>}, {transform_indices = @transform_1, window_bounds = array<i64: 1, 32, 64>}, {transform_indices = @transform_2, window_bounds = array<i64: 1, 64, 16>}, {transform_indices = @transform_3, window_bounds = array<i64: 1, 64, 16>}, {transform_indices = @transform_4, window_bounds = array<i64: 1, 64, 16>}, {transform_indices = @transform_5, window_bounds = array<i64: 1, 1, 16>}, {transform_indices = @transform_6, window_bounds = array<i64: 1, 1, 16>}, {transform_indices = @transform_7, window_bounds = array<i64: 1, 1, 16>}, {transform_indices = @transform_8, window_bounds = array<i64: 1, 1, 32, 16>}]} {
    %c0_i32 = arith.constant 0 : i32
    %0 = arith.cmpi eq, %arg2, %c0_i32 : i32
    %1 = arith.extui %0 : i1 to i32
    %c0_i32_0 = arith.constant 0 : i32
    %2 = arith.cmpi ne, %1, %c0_i32_0 : i32
    scf.if %2 {
      %c0_24 = arith.constant 0 : index
      %c0_25 = arith.constant 0 : index
      %c0_26 = arith.constant 0 : index
      %39 = vector.load %arg5[%c0_24, %c0_25, %c0_26] : memref<1x32x64xf32, #tpu.memory_space<vmem>>, vector<1x32x64xf32>
      %40 = vector.shape_cast %39 : vector<1x32x64xf32> to vector<32x64xf32>
      %c0_27 = arith.constant 0 : index
      %c0_28 = arith.constant 0 : index
      %c0_29 = arith.constant 0 : index
      %41 = vector.load %arg7[%c0_27, %c0_28, %c0_29] : memref<1x64x16xf32, #tpu.memory_space<vmem>>, vector<1x64x16xf32>
      %42 = vector.shape_cast %41 : vector<1x64x16xf32> to vector<64x16xf32>
      %cst_30 = arith.constant dense<0.000000e+00> : vector<32x16xf32>
      %43 = tpu.matmul %40, %42, %cst_30 {dimension_numbers = #tpu.dot_dimension_numbers<[1], [0], [0], [1], [0, 0, 1, 1], [], []>} : vector<32x64xf32>, vector<64x16xf32>, vector<32x16xf32> -> vector<32x16xf32>
      %c0_31 = arith.constant 0 : index
      %c0_32 = arith.constant 0 : index
      %c0_33 = arith.constant 0 : index
      %44 = vector.load %arg10[%c0_31, %c0_32, %c0_33] : memref<1x1x16xf32, #tpu.memory_space<vmem>>, vector<1x1x16xf32>
      %45 = vector.shape_cast %44 : vector<1x1x16xf32> to vector<1x16xf32>
      %46 = vector.broadcast %45 : vector<1x16xf32> to vector<32x16xf32>
      %47 = arith.addf %43, %46 : vector<32x16xf32>
      %c0_34 = arith.constant 0 : index
      %c0_35 = arith.constant 0 : index
      %c0_36 = arith.constant 0 : index
      %48 = vector.load %arg8[%c0_34, %c0_35, %c0_36] : memref<1x64x16xf32, #tpu.memory_space<vmem>>, vector<1x64x16xf32>
      %49 = vector.shape_cast %48 : vector<1x64x16xf32> to vector<64x16xf32>
      %cst_37 = arith.constant dense<0.000000e+00> : vector<32x16xf32>
      %50 = tpu.matmul %40, %49, %cst_37 {dimension_numbers = #tpu.dot_dimension_numbers<[1], [0], [0], [1], [0, 0, 1, 1], [], []>} : vector<32x64xf32>, vector<64x16xf32>, vector<32x16xf32> -> vector<32x16xf32>
      %c0_38 = arith.constant 0 : index
      %c0_39 = arith.constant 0 : index
      %c0_40 = arith.constant 0 : index
      %51 = vector.load %arg11[%c0_38, %c0_39, %c0_40] : memref<1x1x16xf32, #tpu.memory_space<vmem>>, vector<1x1x16xf32>
      %52 = vector.shape_cast %51 : vector<1x1x16xf32> to vector<1x16xf32>
      %53 = vector.broadcast %52 : vector<1x16xf32> to vector<32x16xf32>
      %54 = arith.addf %50, %53 : vector<32x16xf32>
      %55 = arith.index_cast %arg3 : i32 to index
      %c0_41 = arith.constant 0 : index
      %c0_42 = arith.constant 0 : index
      %56 = vector.load %arg17[%55, %c0_41, %c0_42] : memref<2x32x16xf32, #tpu.memory_space<vmem>>, vector<1x32x16xf32>
      %57 = vector.shape_cast %56 : vector<1x32x16xf32> to vector<32x16xf32>
      %58 = vector.shape_cast %47 : vector<32x16xf32> to vector<1x32x16xf32>
      tpu.vector_store %arg17[%55, %c0_41, %c0_42], %58 {strides = array<i32>} : memref<2x32x16xf32, #tpu.memory_space<vmem>>, vector<1x32x16xf32>,
      %59 = arith.index_cast %arg3 : i32 to index
      %c0_43 = arith.constant 0 : index
      %c0_44 = arith.constant 0 : index
      %60 = vector.load %arg18[%59, %c0_43, %c0_44] : memref<2x32x16xf32, #tpu.memory_space<vmem>>, vector<1x32x16xf32>
      %61 = vector.shape_cast %60 : vector<1x32x16xf32> to vector<32x16xf32>
      %62 = vector.shape_cast %54 : vector<32x16xf32> to vector<1x32x16xf32>
      tpu.vector_store %arg18[%59, %c0_43, %c0_44], %62 {strides = array<i32>} : memref<2x32x16xf32, #tpu.memory_space<vmem>>, vector<1x32x16xf32>,
    } else {
    }
    %c0_i32_1 = arith.constant 0 : i32
    %3 = arith.cmpi eq, %arg3, %c0_i32_1 : i32
    %4 = arith.extui %3 : i1 to i32
    %c0_i32_2 = arith.constant 0 : i32
    %5 = arith.cmpi ne, %4, %c0_i32_2 : i32
    scf.if %5 {
      %c0_24 = arith.constant 0 : index
      %c0_25 = arith.constant 0 : index
      %c0_26 = arith.constant 0 : index
      %39 = vector.load %arg4[%c0_24, %c0_25, %c0_26] : memref<1x32x64xf32, #tpu.memory_space<vmem>>, vector<1x32x64xf32>
      %40 = vector.shape_cast %39 : vector<1x32x64xf32> to vector<32x64xf32>
      %c0_27 = arith.constant 0 : index
      %c0_28 = arith.constant 0 : index
      %c0_29 = arith.constant 0 : index
      %41 = vector.load %arg6[%c0_27, %c0_28, %c0_29] : memref<1x64x16xf32, #tpu.memory_space<vmem>>, vector<1x64x16xf32>
      %42 = vector.shape_cast %41 : vector<1x64x16xf32> to vector<64x16xf32>
      %cst_30 = arith.constant dense<0.000000e+00> : vector<32x16xf32>
      %43 = tpu.matmul %40, %42, %cst_30 {dimension_numbers = #tpu.dot_dimension_numbers<[1], [0], [0], [1], [0, 0, 1, 1], [], []>} : vector<32x64xf32>, vector<64x16xf32>, vector<32x16xf32> -> vector<32x16xf32>
      %c0_31 = arith.constant 0 : index
      %c0_32 = arith.constant 0 : index
      %c0_33 = arith.constant 0 : index
      %44 = vector.load %arg9[%c0_31, %c0_32, %c0_33] : memref<1x1x16xf32, #tpu.memory_space<vmem>>, vector<1x1x16xf32>
      %45 = vector.shape_cast %44 : vector<1x1x16xf32> to vector<1x16xf32>
      %46 = vector.broadcast %45 : vector<1x16xf32> to vector<32x16xf32>
      %47 = arith.addf %43, %46 : vector<32x16xf32>
      %cst_34 = arith.constant 6.250000e-02 : f32
      %48 = vector.broadcast %cst_34 : f32 to vector<32x16xf32>
      %49 = arith.mulf %47, %48 : vector<32x16xf32>
      %c0_35 = arith.constant 0 : index
      %c0_36 = arith.constant 0 : index
      %50 = vector.load %arg13[%c0_35, %c0_36] : memref<32x16xf32, #tpu.memory_space<vmem>>, vector<32x16xf32>
      tpu.vector_store %arg13[%c0_35, %c0_36], %49 {strides = array<i32>} : memref<32x16xf32, #tpu.memory_space<vmem>>, vector<32x16xf32>,
      %cst_37 = arith.constant -1.000000e+30 : f32
      %51 = vector.broadcast %cst_37 : f32 to vector<32x1xf32>
      %c0_38 = arith.constant 0 : index
      %c0_39 = arith.constant 0 : index
      %52 = vector.load %arg14[%c0_38, %c0_39] : memref<32x1xf32, #tpu.memory_space<vmem>>, vector<32x1xf32>
      tpu.vector_store %arg14[%c0_38, %c0_39], %51 {strides = array<i32>} : memref<32x1xf32, #tpu.memory_space<vmem>>, vector<32x1xf32>,
      %cst_40 = arith.constant 0.000000e+00 : f32
      %53 = vector.broadcast %cst_40 : f32 to vector<32x1xf32>
      %c0_41 = arith.constant 0 : index
      %c0_42 = arith.constant 0 : index
      %54 = vector.load %arg15[%c0_41, %c0_42] : memref<32x1xf32, #tpu.memory_space<vmem>>, vector<32x1xf32>
      tpu.vector_store %arg15[%c0_41, %c0_42], %53 {strides = array<i32>} : memref<32x1xf32, #tpu.memory_space<vmem>>, vector<32x1xf32>,
      %cst_43 = arith.constant 0.000000e+00 : f32
      %55 = vector.broadcast %cst_43 : f32 to vector<32x16xf32>
      %c0_44 = arith.constant 0 : index
      %c0_45 = arith.constant 0 : index
      %56 = vector.load %arg16[%c0_44, %c0_45] : memref<32x16xf32, #tpu.memory_space<vmem>>, vector<32x16xf32>
      tpu.vector_store %arg16[%c0_44, %c0_45], %55 {strides = array<i32>} : memref<32x16xf32, #tpu.memory_space<vmem>>, vector<32x16xf32>,
    } else {
    }
    %6 = arith.index_cast %arg3 : i32 to index
    %c0 = arith.constant 0 : index
    %c0_3 = arith.constant 0 : index
    %7 = vector.load %arg17[%6, %c0, %c0_3] : memref<2x32x16xf32, #tpu.memory_space<vmem>>, vector<1x32x16xf32>
    %8 = vector.shape_cast %7 : vector<1x32x16xf32> to vector<32x16xf32>
    %9 = arith.index_cast %arg3 : i32 to index
    %c0_4 = arith.constant 0 : index
    %c0_5 = arith.constant 0 : index
    %10 = vector.load %arg18[%9, %c0_4, %c0_5] : memref<2x32x16xf32, #tpu.memory_space<vmem>>, vector<1x32x16xf32>
    %11 = vector.shape_cast %10 : vector<1x32x16xf32> to vector<32x16xf32>
    %c0_6 = arith.constant 0 : index
    %c0_7 = arith.constant 0 : index
    %12 = vector.load %arg13[%c0_6, %c0_7] : memref<32x16xf32, #tpu.memory_space<vmem>>, vector<32x16xf32>
    %cst = arith.constant dense<0.000000e+00> : vector<32x32xf32>
    %13 = tpu.matmul %12, %8, %cst {dimension_numbers = #tpu.dot_dimension_numbers<[1], [1], [0], [0], [0, 0, 1, 0], [], []>} : vector<32x16xf32>, vector<32x16xf32>, vector<32x32xf32> -> vector<32x32xf32>
    %c0_8 = arith.constant 0 : index
    %c0_9 = arith.constant 0 : index
    %14 = vector.load %arg14[%c0_8, %c0_9] : memref<32x1xf32, #tpu.memory_space<vmem>>, vector<32x1xf32>
    %cst_10 = arith.constant dense<0xFF800000> : vector<32xf32>
    %15 = vector.multi_reduction <maximumf>, %13, %cst_10 [1] : vector<32x32xf32> to vector<32xf32>
    %16 = vector.shape_cast %15 : vector<32xf32> to vector<32x1xf32>
    %17 = arith.maximumf %14, %16 : vector<32x1xf32>
    %18 = arith.subf %14, %17 : vector<32x1xf32>
    %19 = math.exp %18 : vector<32x1xf32>
    %20 = vector.broadcast %17 : vector<32x1xf32> to vector<32x32xf32>
    %21 = arith.subf %13, %20 : vector<32x32xf32>
    %22 = math.exp %21 : vector<32x32xf32>
    %c0_11 = arith.constant 0 : index
    %c0_12 = arith.constant 0 : index
    %23 = vector.load %arg15[%c0_11, %c0_12] : memref<32x1xf32, #tpu.memory_space<vmem>>, vector<32x1xf32>
    %24 = arith.mulf %19, %23 : vector<32x1xf32>
    %cst_13 = arith.constant dense<0.000000e+00> : vector<32xf32>
    %25 = vector.multi_reduction <add>, %22, %cst_13 [1] : vector<32x32xf32> to vector<32xf32>
    %26 = vector.shape_cast %25 : vector<32xf32> to vector<32x1xf32>
    %27 = arith.addf %24, %26 : vector<32x1xf32>
    %c0_14 = arith.constant 0 : index
    %c0_15 = arith.constant 0 : index
    %28 = vector.load %arg15[%c0_14, %c0_15] : memref<32x1xf32, #tpu.memory_space<vmem>>, vector<32x1xf32>
    tpu.vector_store %arg15[%c0_14, %c0_15], %27 {strides = array<i32>} : memref<32x1xf32, #tpu.memory_space<vmem>>, vector<32x1xf32>,
    %c0_16 = arith.constant 0 : index
    %c0_17 = arith.constant 0 : index
    %29 = vector.load %arg16[%c0_16, %c0_17] : memref<32x16xf32, #tpu.memory_space<vmem>>, vector<32x16xf32>
    %30 = vector.broadcast %19 : vector<32x1xf32> to vector<32x16xf32>
    %31 = arith.mulf %30, %29 : vector<32x16xf32>
    %cst_18 = arith.constant dense<0.000000e+00> : vector<32x16xf32>
    %32 = tpu.matmul %22, %11, %cst_18 {dimension_numbers = #tpu.dot_dimension_numbers<[1], [0], [0], [1], [0, 0, 1, 1], [], []>} : vector<32x32xf32>, vector<32x16xf32>, vector<32x16xf32> -> vector<32x16xf32>
    %33 = arith.addf %31, %32 : vector<32x16xf32>
    %c0_19 = arith.constant 0 : index
    %c0_20 = arith.constant 0 : index
    %34 = vector.load %arg16[%c0_19, %c0_20] : memref<32x16xf32, #tpu.memory_space<vmem>>, vector<32x16xf32>
    tpu.vector_store %arg16[%c0_19, %c0_20], %33 {strides = array<i32>} : memref<32x16xf32, #tpu.memory_space<vmem>>, vector<32x16xf32>,
    %c0_21 = arith.constant 0 : index
    %c0_22 = arith.constant 0 : index
    %35 = vector.load %arg14[%c0_21, %c0_22] : memref<32x1xf32, #tpu.memory_space<vmem>>, vector<32x1xf32>
    tpu.vector_store %arg14[%c0_21, %c0_22], %17 {strides = array<i32>} : memref<32x1xf32, #tpu.memory_space<vmem>>, vector<32x1xf32>,
    %c1_i32 = arith.constant 1 : i32
    %36 = arith.cmpi eq, %arg3, %c1_i32 : i32
    %37 = arith.extui %36 : i1 to i32
    %c0_i32_23 = arith.constant 0 : i32
    %38 = arith.cmpi ne, %37, %c0_i32_23 : i32
    scf.if %38 {
      %c0_24 = arith.constant 0 : index
      %c0_25 = arith.constant 0 : index
      %39 = vector.load %arg15[%c0_24, %c0_25] : memref<32x1xf32, #tpu.memory_space<vmem>>, vector<32x1xf32>
      %40 = tpu.reciprocal %39 {approx = true} : vector<32x1xf32> -> vector<32x1xf32>
      %c0_26 = arith.constant 0 : index
      %c0_27 = arith.constant 0 : index
      %41 = vector.load %arg16[%c0_26, %c0_27] : memref<32x16xf32, #tpu.memory_space<vmem>>, vector<32x16xf32>
      %42 = vector.broadcast %40 : vector<32x1xf32> to vector<32x16xf32>
      %43 = arith.mulf %41, %42 : vector<32x16xf32>
      %c0_28 = arith.constant 0 : index
      %c0_29 = arith.constant 0 : index
      %c0_30 = arith.constant 0 : index
      %c0_31 = arith.constant 0 : index
      %44 = vector.load %arg12[%c0_28, %c0_29, %c0_30, %c0_31] : memref<1x1x32x16xf32, #tpu.memory_space<vmem>>, vector<1x1x32x16xf32>
      %45 = vector.shape_cast %44 : vector<1x1x32x16xf32> to vector<32x16xf32>
      %46 = vector.shape_cast %43 : vector<32x16xf32> to vector<1x1x32x16xf32>
      tpu.vector_store %arg12[%c0_28, %c0_29, %c0_30, %c0_31], %46 {strides = array<i32>} : memref<1x1x32x16xf32, #tpu.memory_space<vmem>>, vector<1x1x32x16xf32>,
    } else {
    }
    return
  }
  func.func @transform_0(%arg0: i32, %arg1: i32, %arg2: i32, %arg3: i32) -> (i32, i32, i32) {
    %c0_i32 = arith.constant 0 : i32
    %c0_i32_0 = arith.constant 0 : i32
    return %arg0, %arg2, %c0_i32 : i32, i32, i32
  }
  func.func @transform_1(%arg0: i32, %arg1: i32, %arg2: i32, %arg3: i32) -> (i32, i32, i32) {
    %c0_i32 = arith.constant 0 : i32
    %0 = arith.cmpi eq, %arg2, %c0_i32 : i32
    %c1_i32 = arith.constant 1 : i32
    %1 = arith.select %0, %arg3, %c1_i32 : i32
    %c0_i32_0 = arith.constant 0 : i32
    %c0_i32_1 = arith.constant 0 : i32
    return %arg0, %1, %c0_i32_0 : i32, i32, i32
  }
  func.func @transform_2(%arg0: i32, %arg1: i32, %arg2: i32, %arg3: i32) -> (i32, i32, i32) {
    %c0_i32 = arith.constant 0 : i32
    %c0_i32_0 = arith.constant 0 : i32
    %c0_i32_1 = arith.constant 0 : i32
    return %arg1, %c0_i32, %c0_i32_0 : i32, i32, i32
  }
  func.func @transform_3(%arg0: i32, %arg1: i32, %arg2: i32, %arg3: i32) -> (i32, i32, i32) {
    %c0_i32 = arith.constant 0 : i32
    %c0_i32_0 = arith.constant 0 : i32
    %c0_i32_1 = arith.constant 0 : i32
    return %arg1, %c0_i32, %c0_i32_0 : i32, i32, i32
  }
  func.func @transform_4(%arg0: i32, %arg1: i32, %arg2: i32, %arg3: i32) -> (i32, i32, i32) {
    %c0_i32 = arith.constant 0 : i32
    %c0_i32_0 = arith.constant 0 : i32
    %c0_i32_1 = arith.constant 0 : i32
    return %arg1, %c0_i32, %c0_i32_0 : i32, i32, i32
  }
  func.func @transform_5(%arg0: i32, %arg1: i32, %arg2: i32, %arg3: i32) -> (i32, i32, i32) {
    %c0_i32 = arith.constant 0 : i32
    %c0_i32_0 = arith.constant 0 : i32
    %c0_i32_1 = arith.constant 0 : i32
    return %arg1, %c0_i32, %c0_i32_0 : i32, i32, i32
  }
  func.func @transform_6(%arg0: i32, %arg1: i32, %arg2: i32, %arg3: i32) -> (i32, i32, i32) {
    %c0_i32 = arith.constant 0 : i32
    %c0_i32_0 = arith.constant 0 : i32
    %c0_i32_1 = arith.constant 0 : i32
    return %arg1, %c0_i32, %c0_i32_0 : i32, i32, i32
  }
  func.func @transform_7(%arg0: i32, %arg1: i32, %arg2: i32, %arg3: i32) -> (i32, i32, i32) {
    %c0_i32 = arith.constant 0 : i32
    %c0_i32_0 = arith.constant 0 : i32
    %c0_i32_1 = arith.constant 0 : i32
    return %arg1, %c0_i32, %c0_i32_0 : i32, i32, i32
  }
  func.func @transform_8(%arg0: i32, %arg1: i32, %arg2: i32, %arg3: i32) -> (i32, i32, i32, i32) {
    %c0_i32 = arith.constant 0 : i32
    %c0_i32_0 = arith.constant 0 : i32
    return %arg0, %arg1, %arg2, %c0_i32 : i32, i32, i32, i32
  }
}

</mosaic_0001>

<bundles_post_ra>
// kernel: tpu_custom_call.1
= control target key start
LH: loop header
LB: loop body
LE: loop exit
PB: predicated region body
PF: predicated region fallthrough
CT: control target
= control target key end

     0   :  { %s1949_s27 = smov 0   ;;  %s1951_s28 = smov 0   ;;  %s2235_s0 = inlined_call_operand.vmem [shape: f32[2,64,64], index: 0, kind: input, shape index: {}]   ;;  %s2236_s1 = inlined_call_operand.vmem [shape: f32[2,64,64], index: 1, kind: input, shape index: {}]   ;;  %s2237_s2 = inlined_call_operand.vmem [shape: f32[4,64,16], index: 2, kind: input, shape index: {}]   ;;  %s2238_s3 = inlined_call_operand.vmem [shape: f32[4,64,16], index: 3, kind: input, shape index: {}]   ;;  %s2239_s4 = inlined_call_operand.vmem [shape: f32[4,64,16], index: 4, kind: input, shape index: {}]   ;;  %s2240_s5 = inlined_call_operand.vmem [shape: f32[4,1,16], index: 5, kind: input, shape index: {}]   ;;  %s2241_s6 = inlined_call_operand.vmem [shape: f32[4,1,16], index: 6, kind: input, shape index: {}]   ;;  %s2242_s7 = inlined_call_operand.vmem [shape: f32[4,1,16], index: 7, kind: input, shape index: {}]   ;;  %s2243_s8 = inlined_call_operand.vmem [shape: f32[2,4,64,16], index: 8, kind: output, shape index: {}]  }
   0x1   :  { %2251 = sst [smem:[#allocation19_spill]] %s2235_s0  ;;  %s1953_s29 = smov 0  }
   0x2   :  { %2252 = sst [smem:[#allocation20_spill]] %s2237_s2  ;;  %s1955_s30 = smov 0  }
   0x3   :  { %2253 = sst [smem:[#allocation21_spill]] %s2238_s3  ;;  %s1957_s9 = smov 0  }
   0x4   :  { %2254 = sst [smem:[#allocation22_spill]] %s2239_s4  ;;  %s1959_s10 = smov 0  }
   0x5   :  { %s1961_s11 = smov 0   ;;  %s1963_s12 = smov 0  }
   0x6   :  { %s1965_s13 = smov 0  }
   0x7 LB: > { %2255 = sst [smem:[#allocation8_spill]] %s1882_s9  ;;  %s33_s14 = sadd.s32 1, %s1882_s9  ;;  %s1898_s13 = sphi %s1965_s13, %s18_s13   ;;  %s1894_s12 = sphi %s1963_s12, %s2280_s12   ;;  %s1890_s11 = sphi %s1961_s11, %s2279_s11   ;;  %s1886_s10 = sphi %s1959_s10, %s2278_s10   ;;  %s1882_s9 = sphi %s1957_s9, %s2277_s9   ;;  %s1878_s30 = sphi %s1955_s30, %s2276_s30   ;;  %s1874_s29 = sphi %s1953_s29, %s2275_s29   ;;  %s1870_s28 = sphi %s1951_s28, %s2274_s28   ;;  %s1866_s27 = sphi %s1949_s27, %s2273_s27  }
   0x8   : > { %2256 = sst [smem:[#allocation9_spill]] %s1886_s10  ;;  %p34_p0 = scmp.ge.s32.totalorder %s33_s14, 2 }
   0x9   : > { %2257 = sst [smem:[#allocation10_spill]] %s1890_s11  ;;  %s36_s15 = sadd.s32 1, %s1886_s10 }
   0xa   : > { %2258 = sst [smem:[#allocation11_spill]] %s1894_s12  ;;  %p1508_p1 = scmp.ge.s32.totalorder %s1898_s13, 1 }
   0xb   : > { %2259 = sst [smem:[#allocation12_spill]] %s1898_s13  ;;  %s2282_s14 = smov (%p34_p0, %s33_s14), 0 }
   0xc   : > { %2260 = sst [smem:[#allocation13_spill]] %s2282_s14  ;;  %s2284_s15 = smov (!%p34_p0, %s36_s15), %s1886_s10 }
   0xd   : > { %p378_p2 = scmp.lt.s32.totalorder %s1898_s13, 33  ;;  %p38_p3 = scmp.ge.s32.totalorder %s2284_s15, 2 }
   0xe   : > { %s40_s16 = sadd.s32 1, %s1890_s11  ;;  %s44_s17 = sadd.s32 1, %s1894_s12 }
   0xf   : > { %p379_p4 = pnand %p1508_p1, %p378_p2  ;;  %s2286_s15 = smov (%p38_p3, %s2284_s15), 0 }
  0x10   : > { %2261 = sst [smem:[#allocation14_spill]] %s2286_s15  ;;  %s2288_s16 = smov (!%p38_p3, %s40_s16), %s1890_s11 }
  0x11   : > { %p42_p5 = scmp.ge.s32.totalorder %s2288_s16, 4 }
  0x13   : > { %s2290_s16 = smov (%p42_p5, %s2288_s16), 0  ;;  %s2292_s17 = smov (!%p42_p5, %s44_s17), %s1894_s12 }
  0x14   : > { %2262 = sst [smem:[#allocation15_spill]] %s2290_s16  ;;  %p46_p6 = scmp.ge.s32.totalorder %s2292_s17, 2 }
  0x15   : > { %382 = sbr.rel (%p379_p4) target bundleno = 1350 (0x546), region = 52 }
  0x16   : > { %s2294_s17 = smov (%p46_p6, %s2292_s17), 0 }
  0x17   : > { %2263 = sst [smem:[#allocation16_spill]] %s2294_s17 }
  0x1a   : > { %s1509_s18 = sshll.u32 %s1870_s28, 2  ;;  %p460_p7 = scmp.lt.s32.totalorder %s1878_s30, 1 }
  0x1b   : > { %p462_p8 = scmp.lt.s32.totalorder %s1509_s18, 7  ;;  %p469_p9 = scmp.eq.s32.totalorder %s1870_s28, 0 }
  0x1c   : > { %s2296_s30 = smov (!%p460_p7, %s1878_s30), 1  ;;  %p483_p10 = scmp.lt.s32.totalorder %s1874_s29, 3 }
  0x1d   : > { %s2298_s18 = smov (!%p462_p8, %s1509_s18), 7  ;;  %s1510_s19 = sshll.u32 %s2296_s30, 3 }
  0x1e   : > { %s465_s20 = sadd.s32 %s1510_s19, %s2298_s18  ;;  %s2264_s0 = sld [smem:[#allocation19_spill]] }
  0x1f   : > { %s1511_s21 = sshll.u32 %s465_s20, 3  ;;  %s2300_s29 = smov (!%p483_p10, %s1874_s29), 3 }
  0x20   : > { %s470_s25 = scalar_select %p469_p9, %s1866_s27, 1 }
  0x21   : > { %s1523_s17 = sshll.u32 %s2296_s30, 5  ;;  %s1559_s16 = sshll.u32 %s2300_s29, 6 }
  0x22   : > { %s1512_s26 = sshll.u32 %s470_s25, 2  ;;  %s2266_s2 = sld [smem:[#allocation20_spill]] }
  0x23   : > { %p474_p11 = scmp.lt.s32.totalorder %s1512_s26, 7  ;;  %s2268_s3 = sld [smem:[#allocation21_spill]] }
  0x24   : > { %s2015_s24 = scalar_lea.vmem %s2264_s0, %s1511_s21  ;;  %s2269_s4 = sld [smem:[#allocation22_spill]] }
  0x25   : > { %2265 = sst [smem:[#allocation17_spill]] %s2015_s24  ;;  %s2302_s26 = smov (!%p474_p11, %s1512_s26), 7 }
  0x26   : > { %s500_s10 = scalar_lea.vmem %s2240_s5, %s2300_s29  ;;  %s477_s9 = sadd.s32 %s1510_s19, %s2302_s26 }
  0x27   : > { %s503_s15 = scalar_lea.vmem %s2241_s6, %s2300_s29  ;;  %s506_s21 = scalar_lea.vmem %s2242_s7, %s2300_s29 }
  0x28   : > { %s2025_s20 = scalar_lea.vmem %s2266_s2, %s1559_s16  ;;  %s1514_s2 = sshll.u32 %s477_s9, 3 }
  0x29   : > { %2267 = sst [smem:[#allocation18_spill]] %s2025_s20  ;;  %s2030_s23 = scalar_lea.vmem %s2268_s3, %s1559_s16 }
  0x2a   : > { %s2035_s11 = scalar_lea.vmem %s2269_s4, %s1559_s16  ;;  %s2052_s0 = scalar_lea.vmem %s2236_s1, %s1514_s2 }
  0x2b   : > { %s1522_s12 = sshll.u32 %s2300_s29, 3  ;;  %p1525_p12 = scmp.ne.s32.totalorder %s1870_s28, 0 }
  0x2c   : > { %s515_s16 = sadd.s32 %s1522_s12, %s2298_s18  ;;  %s1536_s2 = sshll.u32 (!%p1525_p12), %s1866_s27, 5 }
  0x2d   : > { %s517_s4 = sadd.s32 %s1523_s17, %s515_s16  ;;  %524 = sbr.rel (%p1525_p12) target bundleno = 271 (0x10f), region = 56 }
  0x2e   : > { %s1524_s25 = sshll.u32 %s517_s4, 3  ;;  %s749_s13 = scalar_lea.vmem (!%p1525_p12), [#allocation7], %s1536_s2 }
  0x2f   : > { %s2058_s26 = scalar_lea.vmem %s2243_s8, %s1524_s25 }
  0x32   : > { %v536_v0 = vld [vmem:[%s2030_s23 + $0x38] sm:$0xff]  ;;  %v535_v2 = vld [vmem:[%s2030_s23 + $0x30] sm:$0xff]  ;;  %v534_v4 = vld [vmem:[%s2030_s23 + $0x28] sm:$0xff]  ;;  %vm544_vm0 = vcmask 523264   ;;  %vm744_vm1 = vcmask 130048  }
  0x33   : > { %v649_v1 = vld [vmem:[%s2035_s11 + $0x38] sm:$0xff]  ;;  %1614 = vmatprep.subr.mxu0 %v536_v0  ;;  %v648_v3 = vld [vmem:[%s2035_s11 + $0x30] sm:$0xff]  ;;  %v647_v5 = vld [vmem:[%s2035_s11 + $0x28] sm:$0xff] }
  0x34   : > { %1636 = vmatprep.subr.mxu1 %v649_v1  ;;  %1615 = vmatpush3.msra.mxu0 %v536_v0  ;;  %v533_v6 = vld [vmem:[%s2030_s23 + $0x20] sm:$0xff]  ;;  %v532_v8 = vld [vmem:[%s2030_s23 + $0x18] sm:$0xff]  ;;  %v531_v10 = vld [vmem:[%s2030_s23 + $0x10] sm:$0xff] }
  0x35   : > { %1637 = vmatpush3.msra.mxu1 %v649_v1  ;;  %1616 = vmatprep.subr.mxu0 %v535_v2  ;;  %v646_v7 = vld [vmem:[%s2035_s11 + $0x20] sm:$0xff]  ;;  %v645_v9 = vld [vmem:[%s2035_s11 + $0x18] sm:$0xff]  ;;  %v644_v11 = vld [vmem:[%s2035_s11 + $0x10] sm:$0xff] }
  0x36   : > { %1638 = vmatprep.subr.mxu1 %v648_v3  ;;  %1617 = vmatpush3.msra.mxu0 %v535_v2  ;;  %v530_v12 = vld [vmem:[%s2030_s23 + $0x8] sm:$0xff]  ;;  %v529_v14 = vld [vmem:[%s2030_s23] sm:$0xff]  ;;  %v527_v18 = vld [vmem:[%s2052_s0 + $0x10] sm:$0xff] }
  0x37   : > { %1639 = vmatpush3.msra.mxu1 %v648_v3  ;;  %1618 = vmatprep.subr.mxu0 %v534_v4  ;;  %v643_v13 = vld [vmem:[%s2035_s11 + $0x8] sm:$0xff]  ;;  %v642_v15 = vld [vmem:[%s2035_s11] sm:$0xff]  ;;  %v528_v19 = vld [vmem:[%s2052_s0 + $0x18] sm:$0xff]  ;;  %s743_s11 = scalar_lea.vmem [#allocation6], %s1536_s2 }
  0x38   : > { %1640 = vmatprep.subr.mxu1 %v647_v5  ;;  %1619 = vmatpush3.msra.mxu0 %v534_v4  ;;  %v525_v16 = vld [vmem:[%s2052_s0] sm:$0xff]  ;;  %v526_v17 = vld [vmem:[%s2052_s0 + $0x8] sm:$0xff] }
  0x39   : > { %1641 = vmatpush3.msra.mxu1 %v647_v5  ;;  %1620 = vmatprep.subr.mxu0 %v533_v6  ;;  %v1526_v20 = vld [vmem:[%s503_s15] ss:$0 sm:$0xff] }
  0x3a   : > { %1642 = vmatprep.subr.mxu1 %v646_v7  ;;  %1621 = vmatpush3.msra.mxu0 %v533_v6  ;;  %v1531_v21 = vld [vmem:[%s506_s21] ss:$0 sm:$0xff] }
  0x3b   : > { %1643 = vmatpush3.msra.mxu1 %v646_v7  ;;  %1622 = vmatprep.subr.mxu0 %v532_v8 }
  0x3c   : > { %1644 = vmatprep.subr.mxu1 %v645_v9  ;;  %1623 = vmatpush3.msra.mxu0 %v532_v8 }
  0x3d   : > { %1645 = vmatpush3.msra.mxu1 %v645_v9  ;;  %1624 = vmatprep.subr.mxu0 %v531_v10 }
  0x3e   : > { %1646 = vmatprep.subr.mxu1 %v644_v11  ;;  %1625 = vmatpush3.msra.mxu0 %v531_v10 }
  0x3f   : > { %1647 = vmatpush3.msra.mxu1 %v644_v11  ;;  %1626 = vmatprep.subr.mxu0 %v530_v12 }
  0x40   : > { %1648 = vmatprep.subr.mxu1 %v643_v13  ;;  %1627 = vmatpush3.msra.mxu0 %v530_v12 }
  0x41   : > { %1649 = vmatpush3.msra.mxu1 %v643_v13  ;;  %1628 = vmatprep.subr.mxu0 %v529_v14 }
  0x42   : > { %1650 = vmatprep.subr.mxu1 %v642_v15  ;;  %1629 = vmatpush3.msra.mxu0 %v529_v14 }
  0x43   : > { %1630 = vmatprep.mubr.msk.f32.mxu0 %vm544_vm0, %v525_v16  ;;  %1651 = vmatpush3.msra.mxu1 %v642_v15 }
  0x44   : > { %1652 = vmatprep.mubr.msk.f32.mxu1 %vm544_vm0, %v525_v16  ;;  %1631 = vmatmul.mubr.msk.f32.vlgmr.msra.gmra.mxu0 %vm544_vm0, %v526_v17 }
  0x45   : > { %1653 = vmatmul.mubr.msk.f32.vlgmr.msra.gmra.mxu1 %vm544_vm0, %v526_v17  ;;  %1633 = vmatprep.mubr.msk.f32.mxu0 %vm544_vm0, %v527_v18 }
  0x46   : > { %1655 = vmatprep.mubr.msk.f32.mxu1 %vm544_vm0, %v527_v18 }
  0x48   : > { %1634 = vmatmul.mubr.msk.f32.gmra.mxu0 %vm544_vm0, %v528_v19 }
  0x49   : > { %1656 = vmatmul.mubr.msk.f32.gmra.mxu1 %vm544_vm0, %v528_v19 }
 0x104   : > { %v1632_v22 = vpop.f32.mrf.mxu0 }
 0x105   : > { %v1654_v23 = vpop.f32.mrf.mxu1  ;;  %v629_v24 = vadd.f32 %v1632_v22, %v1526_v20 }
 0x106   : > { %v729_v25 = vadd.f32 %v1654_v23, %v1531_v21  ;;  %v623_v26 = vpop.f32.mrf.mxu0 }
 0x107   : > { %v723_v27 = vpop.f32.mrf.mxu1  ;;  %746 = vst.msk [vmem:[%s743_s11 + $0x8] sm:$0xff] %vm744_vm1, %v629_v24  ;;  %v624_v28 = vadd.f32 %v1526_v20, %v623_v26 }
 0x108   : > { %751 = vst.msk [vmem:[%s749_s13 + $0x8] sm:$0xff] %vm744_vm1, %v729_v25  ;;  %v724_v29 = vadd.f32 %v1531_v21, %v723_v27  ;;  %v1635_v30 = vpop.f32.mrf.mxu0 }
 0x109   : > { %v1657_v31 = vpop.f32.mrf.mxu1  ;;  %745 = vst.msk [vmem:[%s743_s11] sm:$0xff] %vm744_vm1, %v624_v28  ;;  %v639_v32 = vadd.f32 %v1635_v30, %v1526_v20 }
 0x10a   : > { %750 = vst.msk [vmem:[%s749_s13] sm:$0xff] %vm744_vm1, %v724_v29  ;;  %v739_v33 = vadd.f32 %v1657_v31, %v1531_v21  ;;  %v633_v34 = vpop.f32.mrf.mxu0 }
 0x10b   : > { %v733_v35 = vpop.f32.mrf.mxu1  ;;  %748 = vst.msk [vmem:[%s743_s11 + $0x18] sm:$0xff] %vm744_vm1, %v639_v32  ;;  %v634_v36 = vadd.f32 %v1526_v20, %v633_v34 }
 0x10c   : > { %753 = vst.msk [vmem:[%s749_s13 + $0x18] sm:$0xff] %vm744_vm1, %v739_v33  ;;  %v734_v37 = vadd.f32 %v1531_v21, %v733_v35 }
 0x10d   : > { %747 = vst.msk [vmem:[%s743_s11 + $0x10] sm:$0xff] %vm744_vm1, %v634_v36 }
 0x10e   : > { %752 = vst.msk [vmem:[%s749_s13 + $0x10] sm:$0xff] %vm744_vm1, %v734_v37 }
 0x10f PF: > { %p1537_p13 = scmp.ne.s32.totalorder %s1866_s27, 0 }
 0x110   : > { %s2270_s17 = sld [smem:[#allocation18_spill]] (!%p1537_p13) }
 0x111   : > { %757 = sbr.rel (%p1537_p13) target bundleno = 496 (0x1f0), region = 60  ;;  %s2271_s18 = sld [smem:[#allocation17_spill]] (!%p1537_p13) }
 0x116   : > { %v769_v38 = vld [vmem:[%s2270_s17 + $0x38] sm:$0xff]  ;;  %v768_v39 = vld [vmem:[%s2270_s17 + $0x30] sm:$0xff]  ;;  %v767_v40 = vld [vmem:[%s2270_s17 + $0x28] sm:$0xff]  ;;  %vm777_vm2 = vcmask 523264   ;;  %vm879_vm3 = vcmask 130048   ;;  %vm884_vm4 = vcmask 7168  }
 0x117   : > { %1658 = vmatprep.subr.mxu0 %v769_v38  ;;  %1708 = vmatprep.subr.mxu1 %v769_v38  ;;  %v766_v41 = vld [vmem:[%s2270_s17 + $0x20] sm:$0xff]  ;;  %v765_v42 = vld [vmem:[%s2270_s17 + $0x18] sm:$0xff]  ;;  %v764_v43 = vld [vmem:[%s2270_s17 + $0x10] sm:$0xff]  ;;  %v1900_v50 = vmov -1e+30   ;;  %v1901_v51 = vmov 0.0  }
 0x118   : > { %1659 = vmatpush3.msra.mxu0 %v769_v38  ;;  %1716 = vmatpush3.msra.mxu1 %v769_v38  ;;  %v763_v44 = vld [vmem:[%s2270_s17 + $0x8] sm:$0xff]  ;;  %v762_v45 = vld [vmem:[%s2270_s17] sm:$0xff]  ;;  %v760_v47 = vld [vmem:[%s2271_s18 + $0x10] sm:$0xff]  ;;  %885 = vst.msk [vmem:[#allocation3] sm:$0xff] %vm884_vm4, %v1900_v50 }
 0x119   : > { %1660 = vmatprep.subr.mxu0 %v768_v39  ;;  %1709 = vmatprep.subr.mxu1 %v768_v39  ;;  %v758_v46 = vld [vmem:[%s2271_s18] sm:$0xff]  ;;  %v759_v48 = vld [vmem:[%s2271_s18 + $0x8] sm:$0xff]  ;;  %v761_v49 = vld [vmem:[%s2271_s18 + $0x18] sm:$0xff]  ;;  %886 = vst.msk [vmem:[#allocation3 + $0x8] sm:$0xff] %vm884_vm4, %v1900_v50 }
 0x11a   : > { %1661 = vmatpush3.msra.mxu0 %v768_v39  ;;  %1717 = vmatpush3.msra.mxu1 %v768_v39  ;;  %887 = vst.msk [vmem:[#allocation3 + $0x10] sm:$0xff] %vm884_vm4, %v1900_v50  ;;  %888 = vst.msk [vmem:[#allocation3 + $0x18] sm:$0xff] %vm884_vm4, %v1900_v50  ;;  %v1538_v52 = vld [vmem:[%s500_s10] ss:$0 sm:$0xff] }
 0x11b   : > { %1662 = vmatprep.subr.mxu0 %v767_v40  ;;  %1710 = vmatprep.subr.mxu1 %v767_v40  ;;  %889 = vst.msk [vmem:[#allocation4] sm:$0xff] %vm884_vm4, %v1901_v51  ;;  %890 = vst.msk [vmem:[#allocation4 + $0x8] sm:$0xff] %vm884_vm4, %v1901_v51 }
 0x11c   : > { %1663 = vmatpush3.msra.mxu0 %v767_v40  ;;  %1718 = vmatpush3.msra.mxu1 %v767_v40  ;;  %891 = vst.msk [vmem:[#allocation4 + $0x10] sm:$0xff] %vm884_vm4, %v1901_v51  ;;  %892 = vst.msk [vmem:[#allocation4 + $0x18] sm:$0xff] %vm884_vm4, %v1901_v51 }
 0x11d   : > { %1664 = vmatprep.subr.mxu0 %v766_v41  ;;  %1711 = vmatprep.subr.mxu1 %v766_v41  ;;  %893 = vst.msk [vmem:[#allocation5] sm:$0xff] %vm879_vm3, %v1901_v51  ;;  %894 = vst.msk [vmem:[#allocation5 + $0x8] sm:$0xff] %vm879_vm3, %v1901_v51 }
 0x11e   : > { %1665 = vmatpush3.msra.mxu0 %v766_v41  ;;  %1719 = vmatpush3.msra.mxu1 %v766_v41  ;;  %895 = vst.msk [vmem:[#allocation5 + $0x10] sm:$0xff] %vm879_vm3, %v1901_v51  ;;  %896 = vst.msk [vmem:[#allocation5 + $0x18] sm:$0xff] %vm879_vm3, %v1901_v51 }
 0x11f   : > { %1666 = vmatprep.subr.mxu0 %v765_v42  ;;  %1712 = vmatprep.subr.mxu1 %v765_v42 }
 0x120   : > { %1667 = vmatpush3.msra.mxu0 %v765_v42  ;;  %1720 = vmatpush3.msra.mxu1 %v765_v42 }
 0x121   : > { %1668 = vmatprep.subr.mxu0 %v764_v43  ;;  %1713 = vmatprep.subr.mxu1 %v764_v43 }
 0x122   : > { %1669 = vmatpush3.msra.mxu0 %v764_v43  ;;  %1721 = vmatpush3.msra.mxu1 %v764_v43 }
 0x123   : > { %1670 = vmatprep.subr.mxu0 %v763_v44  ;;  %1714 = vmatprep.subr.mxu1 %v763_v44 }
 0x124   : > { %1671 = vmatpush3.msra.mxu0 %v763_v44  ;;  %1722 = vmatpush3.msra.mxu1 %v763_v44 }
 0x125   : > { %1672 = vmatprep.subr.mxu0 %v762_v45  ;;  %1715 = vmatprep.subr.mxu1 %v762_v45 }
 0x126   : > { %1673 = vmatpush3.msra.mxu0 %v762_v45  ;;  %1723 = vmatpush3.msra.mxu1 %v762_v45 }
 0x127   : > { %1674 = vmatprep.mubr.msk.f32.mxu0 %vm777_vm2, %v758_v46  ;;  %1677 = vmatprep.mubr.msk.f32.mxu1 %vm777_vm2, %v760_v47 }
 0x128   : > { %1675 = vmatmul.mubr.msk.f32.vlgmr.msra.gmra.mxu0 %vm777_vm2, %v759_v48  ;;  %1678 = vmatmul.mubr.msk.f32.vlgmr.msra.gmra.mxu1 %vm777_vm2, %v761_v49 }
 0x1e8   : > { %v1676_v53 = vpop.f32.mrf.mxu0  ;;  %v1679_v54 = vpop.f32.mrf.mxu1 }
 0x1e9   : > { %v862_v55 = vadd.f32 %v1676_v53, %v1538_v52  ;;  %v872_v56 = vadd.f32 %v1679_v54, %v1538_v52 }
 0x1ea   : > { %v856_v57 = vpop.f32.mrf.mxu0  ;;  %v866_v58 = vpop.f32.mrf.mxu1 }
 0x1eb   : > { %v876_v59 = vmul.f32 0.0625, %v862_v55  ;;  %v878_v60 = vmul.f32 0.0625, %v872_v56  ;;  %v857_v61 = vadd.f32 %v1538_v52, %v856_v57  ;;  %v867_v62 = vadd.f32 %v1538_v52, %v866_v58 }
 0x1ed   : > { %881 = vst.msk [vmem:[#allocation2 + $0x8] sm:$0xff] %vm879_vm3, %v876_v59  ;;  %883 = vst.msk [vmem:[#allocation2 + $0x18] sm:$0xff] %vm879_vm3, %v878_v60  ;;  %v875_v63 = vmul.f32 0.0625, %v857_v61  ;;  %v877_v0 = vmul.f32 0.0625, %v867_v62 }
 0x1ef   : > { %880 = vst.msk [vmem:[#allocation2] sm:$0xff] %vm879_vm3, %v875_v63  ;;  %882 = vst.msk [vmem:[#allocation2 + $0x10] sm:$0xff] %vm879_vm3, %v877_v0 }
 0x1f0 PF: > { %s1543_s29 = sshll.u32 %s1866_s27, 5  ;;  %vm912_vm5 = vcmask 130048   ;;  %vm1026_vm6 = vcmask 261120   ;;  %v1902_v17 = vmov 0   ;;  %v1022_v18 = vld [vmem:[#allocation3] sm:$0xff]  ;;  %vm1111_vm7 = vcmask 7168  }
 0x1f1   : > { %s898_s10 = scalar_lea.vmem [#allocation6], %s1543_s29  ;;  %1800 = vset.pattern.permute.xlu0 %v1902_v17  ;;  %1801 = vset.pattern.permute.xlu1 %v1902_v17  ;;  %v2165_v21 = vld [vmem:[#allocation3 + $0x8] sm:$0xff]  ;;  %v1024_v22 = vld [vmem:[#allocation3 + $0x10] sm:$0xff]  ;;  %v2169_v29 = vld [vmem:[#allocation3 + $0x18] sm:$0xff]  ;;  %s903_s23 = scalar_lea.vmem [#allocation7], %s1543_s29 }
 0x1f2   : > { %v902_v2 = vld [vmem:[%s898_s10 + $0x18] sm:$0xff]  ;;  %v901_v3 = vld [vmem:[%s898_s10 + $0x10] sm:$0xff]  ;;  %v900_v4 = vld [vmem:[%s898_s10 + $0x8] sm:$0xff]  ;;  %p1556_p0 = scmp.ne.s32.totalorder %s1866_s27, 1 }
 0x1f3   : > { %1680 = vmatprep.subr.msk.mxu0 %vm912_vm5, %v902_v2  ;;  %v899_v5 = vld [vmem:[%s898_s10] sm:$0xff]  ;;  %v907_v36 = vld [vmem:[%s903_s23 + $0x18] sm:$0xff]  ;;  %v906_v37 = vld [vmem:[%s903_s23 + $0x10] sm:$0xff] }
 0x1f4   : > { %1681 = vmatpush3.xpose.msk.msra.mxu0 %vm912_vm5, %v902_v2  ;;  %v909_v6 = vld [vmem:[#allocation2 + $0x8] sm:$0xff]  ;;  %v911_v8 = vld [vmem:[#allocation2 + $0x18] sm:$0xff]  ;;  %1694 = vmatprep.subr.mxu1 %v907_v36  ;;  %v904_v39 = vld [vmem:[%s903_s23] sm:$0xff] }
 0x1f5   : > { %1682 = vmatprep.subr.msk.mxu0 %vm912_vm5, %v901_v3  ;;  %1695 = vmatpush3.msra.mxu1 %v907_v36  ;;  %v905_v38 = vld [vmem:[%s903_s23 + $0x8] sm:$0xff] }
 0x1f6   : > { %v908_v1 = vld [vmem:[#allocation2] sm:$0xff]  ;;  %v910_v7 = vld [vmem:[#allocation2 + $0x10] sm:$0xff]  ;;  %1696 = vmatprep.subr.mxu1 %v906_v37 }
 0x1f7   : > { %1688 = vmatprep.mubr.msk.f32.mxu0 %vm912_vm5, %v908_v1  ;;  %1697 = vmatpush3.msra.mxu1 %v906_v37 }
 0x1f8   : > { %1683 = vmatpush3.xpose.msk.msra.mxu0 %vm912_vm5, %v901_v3  ;;  %1698 = vmatprep.subr.mxu1 %v905_v38 }
 0x1f9   : > { %1684 = vmatprep.subr.msk.mxu0 %vm912_vm5, %v900_v4  ;;  %1699 = vmatpush3.msra.mxu1 %v905_v38 }
 0x1fa   : > { %1700 = vmatprep.subr.mxu1 %v904_v39 }
 0x1fb   : > { %1701 = vmatpush3.msra.mxu1 %v904_v39 }
 0x1fc   : > { %1685 = vmatpush3.xpose.msk.msra.mxu0 %vm912_vm5, %v900_v4  ;;  %v1087_v4 = vld [vmem:[#allocation4] sm:$0xff] }
 0x1fd   : > { %1686 = vmatprep.subr.msk.mxu0 %vm912_vm5, %v899_v5 }
 0x200   : > { %1687 = vmatpush3.xpose.msk.msra.mxu0 %vm912_vm5, %v899_v5 }
 0x203   : > { %1689 = vmatmul.mubr.msk.f32.vlgmr.msra.gmra.mxu0 %vm912_vm5, %v909_v6 }
 0x204   : > { %1691 = vmatprep.mubr.msk.f32.mxu0 %vm912_vm5, %v910_v7  ;;  %v1088_v7 = vld [vmem:[#allocation4 + $0x8] sm:$0xff] }
 0x207   : > { %1692 = vmatmul.mubr.msk.f32.gmra.mxu0 %vm912_vm5, %v911_v8 }
 0x2c3   : > { %v2149_v9 = vpop.f32.mrf.mxu0 }
 0x2c4   : > { %v1030_v14 = vsel %vm1026_vm6, %v2149_v9, -inf }
 0x2c5   : > { %v2151_v10 = vpop.f32.mrf.mxu0 }
 0x2c6   : > { %v1027_v11 = vsel %vm1026_vm6, %v2151_v10, -inf }
 0x2c7   : > { %1028 = vmax.xlane.f32.xlu0 %v1027_v11  ;;  %v2155_v12 = vpop.f32.mrf.mxu0 }
 0x2c8   : > { %v1036_v16 = vsel %vm1026_vm6, %v2155_v12, -inf }
 0x2c9   : > { %v2157_v13 = vpop.f32.mrf.mxu0 }
 0x2ca   : > { %v1033_v15 = vsel %vm1026_vm6, %v2157_v13, -inf }
 0x2cb   : > { %1031 = vmax.xlane.f32.xlu0 %v1030_v14  ;;  %1034 = vmax.xlane.f32.xlu1 %v1033_v15  ;;  %v1089_v15 = vld [vmem:[#allocation4 + $0x10] sm:$0xff] }
 0x2cf   : > { %1037 = vmax.xlane.f32.xlu1 %v1036_v16 }
 0x350   : > { %v1029_v19 = vpop.xlane.xlu0 %1028 }
 0x351   : > { %v1039_v20 = vmax.f32 %v1022_v18, %v1029_v19 }
 0x353   : > { %v1043_v23 = vsub.f32 %v1022_v18, %v1039_v20  ;;  %1249 = vst.msk [vmem:[#allocation3] sm:$0xff] %vm1111_vm7, %v1039_v20  ;;  %1057 = vperm.xlu0 %1800, %v1039_v20   ;;  %v1117_v20 = vld [vmem:[#allocation5 + $0x8] sm:$0xff] }
 0x354   : > { %v1032_v24 = vpop.xlane.xlu0 %1031  ;;  %v1035_v25 = vpop.xlane.xlu1 %1034 }
 0x355   : > { %v1047_v26 = vmul.f32 1.442695, %v1043_v23  ;;  %v1040_v27 = vmax.f32 %v2165_v21, %v1032_v24  ;;  %v1041_v28 = vmax.f32 %v1024_v22, %v1035_v25 }
 0x357   : > { %1802 = vpow2.f32 %v1047_v26  ;;  %v1044_v30 = vsub.f32 %v2165_v21, %v1040_v27  ;;  %1250 = vst.msk [vmem:[#allocation3 + $0x8] sm:$0xff] %vm1111_vm7, %v1040_v27  ;;  %v1045_v31 = vsub.f32 %v1024_v22, %v1041_v28  ;;  %1251 = vst.msk [vmem:[#allocation3 + $0x10] sm:$0xff] %vm1111_vm7, %v1041_v28  ;;  %1062 = vperm.xlu1 %1801, %v1040_v27   ;;  %v1116_v22 = vld [vmem:[#allocation5] sm:$0xff] }
 0x358   : > { %v1038_v32 = vpop.xlane.xlu1 %1037 }
 0x359   : > { %v1051_v33 = vmul.f32 1.442695, %v1045_v31  ;;  %v1042_v34 = vmax.f32 %v2169_v29, %v1038_v32  ;;  %v1049_v59 = vmul.f32 1.442695, %v1044_v30  ;;  %v1118_v31 = vld [vmem:[#allocation5 + $0x10] sm:$0xff] }
 0x35b   : > { %v1046_v35 = vsub.f32 %v2169_v29, %v1042_v34  ;;  %1252 = vst.msk [vmem:[#allocation3 + $0x18] sm:$0xff] %vm1111_vm7, %v1042_v34  ;;  %1067 = vperm.xlu1 %1801, %v1041_v28   ;;  %1804 = vpow2.f32 %v1051_v33  ;;  %v1119_v29 = vld [vmem:[#allocation5 + $0x18] sm:$0xff] }
 0x35d   : > { %v1053_v62 = vmul.f32 1.442695, %v1046_v35 }
 0x35f   : > { %1072 = vperm.xlu1 %1801, %v1042_v34  }
 0x364   : > { %v1803_v40 = vpop.eup %1802 }
 0x365   : > { %1122 = vperm.xlu1 %1801, %v1803_v40   ;;  %v1091_v5 = vmul.f32 %v1803_v40, %v1087_v4 }
 0x368   : > { %v1805_v41 = vpop.eup %1804 }
 0x369   : > { %1132 = vperm.xlu1 %1801, %v1805_v41   ;;  %v1093_v17 = vmul.f32 %v1805_v41, %v1089_v15 }
 0x3ce   : > { %v1058_v42 = vpop.permute.xlu0 %1057 }
 0x3cf   : > { %v1075_v43 = vsub.f32 %v2151_v10, %v1058_v42 }
 0x3d1   : > { %v1079_v44 = vmul.f32 1.442695, %v1075_v43 }
 0x3d2   : > { %v1063_v45 = vpop.permute.xlu1 %1062 }
 0x3d3   : > { %1806 = vpow2.f32 %v1079_v44  ;;  %v1076_v46 = vsub.f32 %v2149_v9, %v1063_v45 }
 0x3d5   : > { %v1081_v47 = vmul.f32 1.442695, %v1076_v46 }
 0x3d6   : > { %v1068_v48 = vpop.permute.xlu1 %1067 }
 0x3d7   : > { %1808 = vpow2.f32 %v1081_v47  ;;  %v1077_v49 = vsub.f32 %v2157_v13, %v1068_v48 }
 0x3d9   : > { %v1083_v50 = vmul.f32 1.442695, %v1077_v49 }
 0x3da   : > { %v1073_v51 = vpop.permute.xlu1 %1072 }
 0x3db   : > { %1810 = vpow2.f32 %v1083_v50  ;;  %v1078_v52 = vsub.f32 %v2155_v12, %v1073_v51  ;;  %v1090_v12 = vld [vmem:[#allocation4 + $0x18] sm:$0xff] }
 0x3dd   : > { %v1085_v53 = vmul.f32 1.442695, %v1078_v52 }
 0x3df   : > { %1812 = vpow2.f32 %v1085_v53 }
 0x3e0   : > { %v1807_v54 = vpop.eup %1806  ;;  %1814 = vpow2.f32 %v1049_v59  ;;  %v1123_v2 = vpop.permute.xlu1 %1122 }
 0x3e1   : > { %1702 = vmatprep.mubr.msk.f32.mxu1 %vm1026_vm6, %v1807_v54  ;;  %v1095_v55 = vsel %vm1026_vm6, %v1807_v54, 0.0  ;;  %1816 = vpow2.f32 %v1053_v62  ;;  %v1140_v25 = vmul.f32 %v1123_v2, %v1116_v22 }
 0x3e2   : > { %1096 = vadd.xlane.f32.xlu1 %v1095_v55 }
 0x3e4   : > { %v1809_v56 = vpop.eup %1808  ;;  %v1133_v3 = vpop.permute.xlu1 %1132 }
 0x3e5   : > { %1703 = vmatmul.mubr.msk.f32.vlgmr.msra.gmra.mxu1 %vm1026_vm6, %v1809_v56  ;;  %v1098_v57 = vsel %vm1026_vm6, %v1809_v56, 0.0  ;;  %v1142_v34 = vmul.f32 %v1133_v3, %v1118_v31 }
 0x3e6   : > { %1099 = vadd.xlane.f32.xlu0 %v1098_v57 }
 0x3e8   : > { %v1811_v58 = vpop.eup %1810 }
 0x3e9   : > { %1705 = vmatprep.mubr.msk.f32.mxu1 %vm1026_vm6, %v1811_v58  ;;  %v1101_v63 = vsel %vm1026_vm6, %v1811_v58, 0.0 }
 0x3ec   : > { %v1813_v60 = vpop.eup %1812 }
 0x3ed   : > { %1706 = vmatmul.mubr.msk.f32.gmra.mxu1 %vm1026_vm6, %v1813_v60  ;;  %v1104_v61 = vsel %vm1026_vm6, %v1813_v60, 0.0  ;;  %v1815_v0 = vpop.eup %1814 }
 0x3ee   : > { %1105 = vadd.xlane.f32.xlu1 %v1104_v61  ;;  %v1817_v1 = vpop.eup %1816  ;;  %v1092_v9 = vmul.f32 %v1815_v0, %v1088_v7 }
 0x3ef   : > { %v1094_v13 = vmul.f32 %v1817_v1, %v1090_v12 }
 0x3f2   : > { %1102 = vadd.xlane.f32.xlu1 %v1101_v63 }
 0x3fc   : > { %1127 = vperm.xlu0 %1800, %v1815_v0  }
 0x403   : > { %1137 = vperm.xlu1 %1801, %v1817_v1  }
 0x46b   : > { %v1097_v6 = vpop.xlane.xlu1 %1096 }
 0x46c   : > { %v1107_v8 = vadd.f32 %v1097_v6, %v1091_v5 }
 0x46e   : > { %1112 = vst.msk [vmem:[#allocation4] sm:$0xff] %vm1111_vm7, %v1107_v8 }
 0x46f   : > { %v1100_v10 = vpop.xlane.xlu0 %1099 }
 0x470   : > { %v1108_v11 = vadd.f32 %v1100_v10, %v1092_v9 }
 0x472   : > { %1113 = vst.msk [vmem:[#allocation4 + $0x8] sm:$0xff] %vm1111_vm7, %v1108_v11 }
 0x477   : > { %v1106_v14 = vpop.xlane.xlu1 %1105  ;;  %v1128_v21 = vpop.permute.xlu0 %1127 }
 0x478   : > { %v1110_v16 = vadd.f32 %v1106_v14, %v1094_v13  ;;  %v1141_v23 = vmul.f32 %v1128_v21, %v1117_v20 }
 0x47a   : > { %1115 = vst.msk [vmem:[#allocation4 + $0x18] sm:$0xff] %vm1111_vm7, %v1110_v16 }
 0x47b   : > { %v1103_v18 = vpop.xlane.xlu1 %1102 }
 0x47c   : > { %v1109_v19 = vadd.f32 %v1103_v18, %v1093_v17 }
 0x47e   : > { %1114 = vst.msk [vmem:[#allocation4 + $0x10] sm:$0xff] %vm1111_vm7, %v1109_v19 }
 0x47f   : > { %v1138_v30 = vpop.permute.xlu1 %1137 }
 0x480   : > { %v1143_v32 = vmul.f32 %v1138_v30, %v1119_v29 }
 0x4a5   : > { %v1704_v24 = vpop.f32.mrf.mxu1 }
 0x4a6   : > { %v1242_v26 = vadd.f32 %v1704_v24, %v1141_v23 }
 0x4a7   : > { %v1222_v27 = vpop.f32.mrf.mxu1 }
 0x4a8   : > { %1246 = vst.msk [vmem:[#allocation5 + $0x8] sm:$0xff] %vm912_vm5, %v1242_v26  ;;  %v1241_v28 = vadd.f32 %v1222_v27, %v1140_v25 }
 0x4aa   : > { %1245 = vst.msk [vmem:[#allocation5] sm:$0xff] %vm912_vm5, %v1241_v28 }
 0x4ad   : > { %v1707_v33 = vpop.f32.mrf.mxu1 }
 0x4ae   : > { %v1244_v35 = vadd.f32 %v1707_v33, %v1143_v32  ;;  %1256 = sbr.rel (%p1556_p0) target bundleno = 1350 (0x546), region = 64 }
 0x4af   : > { %v1232_v36 = vpop.f32.mrf.mxu1 }
 0x4b0   : > { %1248 = vst.msk [vmem:[#allocation5 + $0x18] sm:$0xff] %vm912_vm5, %v1244_v35  ;;  %v1243_v37 = vadd.f32 %v1232_v36, %v1142_v34 }
 0x4b2   : > { %1247 = vst.msk [vmem:[#allocation5 + $0x10] sm:$0xff] %vm912_vm5, %v1243_v37 }
 0x4b3   : > { %v1259_v38 = vld [vmem:[#allocation4 + $0x10] sm:$0xff]  ;;  %v1257_v39 = vld [vmem:[#allocation4] sm:$0xff]  ;;  %v1260_v40 = vld [vmem:[#allocation4 + $0x18] sm:$0xff]  ;;  %v1903_v41 = vmov 0  }
 0x4b4   : > { %1819 = vset.pattern.permute.xlu1 %v1903_v41  ;;  %1818 = vset.pattern.permute.xlu0 %v1903_v41  ;;  %1820 = vrcp.f32 %v1259_v38  ;;  %v1258_v42 = vld [vmem:[#allocation4 + $0x8] sm:$0xff]  ;;  %v1265_v48 = vld [vmem:[#allocation5] sm:$0xff] }
 0x4b5   : > { %1822 = vrcp.f32 %v1257_v39  ;;  %v1266_v54 = vld [vmem:[#allocation5 + $0x8] sm:$0xff] }
 0x4b6   : > { %1824 = vrcp.f32 %v1260_v40 }
 0x4b7   : > { %1826 = vrcp.f32 %v1258_v42  ;;  %v1268_v53 = vld [vmem:[#allocation5 + $0x18] sm:$0xff] }
 0x4b9   : > { %v1267_v47 = vld [vmem:[#allocation5 + $0x10] sm:$0xff] }
 0x4c1   : > { %v1821_v43 = vpop.eup %1820 }
 0x4c2   : > { %v1823_v44 = vpop.eup %1822  ;;  %1281 = vperm.xlu1 %1819, %v1821_v43  }
 0x4c3   : > { %v1825_v45 = vpop.eup %1824  ;;  %1271 = vperm.xlu0 %1818, %v1823_v44  }
 0x4c4   : > { %v1827_v46 = vpop.eup %1826 }
 0x4c6   : > { %1286 = vperm.xlu1 %1819, %v1825_v45  }
 0x4c7   : > { %1276 = vperm.xlu0 %1818, %v1827_v46  }
 0x53d   : > { %v1282_v49 = vpop.permute.xlu1 %1281 }
 0x53e   : > { %v1291_v50 = vmul.f32 %v1282_v49, %v1267_v47  ;;  %v1272_v51 = vpop.permute.xlu0 %1271 }
 0x53f   : > { %v1289_v52 = vmul.f32 %v1272_v51, %v1265_v48 }
 0x540   : > { %1295 = vst.msk [vmem:[%s2058_s26 + $0x10] sm:$0xff] %vm912_vm5, %v1291_v50 }
 0x541   : > { %1293 = vst.msk [vmem:[%s2058_s26] sm:$0xff] %vm912_vm5, %v1289_v52  ;;  %v1287_v55 = vpop.permute.xlu1 %1286 }
 0x542   : > { %v1292_v56 = vmul.f32 %v1287_v55, %v1268_v53  ;;  %v1277_v57 = vpop.permute.xlu0 %1276 }
 0x543   : > { %v1290_v58 = vmul.f32 %v1277_v57, %v1266_v54 }
 0x544   : > { %1296 = vst.msk [vmem:[%s2058_s26 + $0x18] sm:$0xff] %vm912_vm5, %v1292_v56 }
 0x545   : > { %1294 = vst.msk [vmem:[%s2058_s26 + $0x8] sm:$0xff] %vm912_vm5, %v1290_v58 }
 0x546 PF: > { %s2272_s27 = sld [smem:[#allocation12_spill]] }
 0x547   : > { %s2274_s28 = sld [smem:[#allocation9_spill]] }
 0x548   : > { %s2275_s29 = sld [smem:[#allocation10_spill]] }
 0x549   : > { %s2276_s30 = sld [smem:[#allocation11_spill]] }
 0x54a   : > { %s2277_s9 = sld [smem:[#allocation13_spill]] }
 0x54b   : > { %s2278_s10 = sld [smem:[#allocation14_spill]] }
 0x54c   : > { %s18_s13 = sadd.s32 1, %s2272_s27   ;;  %s2273_s27 = sld [smem:[#allocation8_spill]] }
 0x54d   : > { %p15_p1 = scmp.ge.s32.totalorder %s18_s13, 34   ;;  %s2279_s11 = sld [smem:[#allocation15_spill]] }
 0x54e   : > { %s2280_s12 = sld [smem:[#allocation16_spill]] }
 0x54f   :  { %17 = sbr.rel (!%p15_p1) target bundleno = 7 (0x7), region = 119 }

</bundles_post_ra>
